<compile_context>
chip_gen: v7x
topology: tpu7x:2x2x1
jax: 0.10.0
libtpu: 0.0.40
codegen_flags: <defaults>
</compile_context>

<pallas_src>
import functools
import inspect
from typing import NamedTuple, Optional

import jax
import jax.numpy as jnp
from jax import lax
from jax.experimental import pallas as pl
from jax.experimental.pallas import tpu as pltpu

LN_EPS = 1e-5


def _round_up(x, m):
    return (x + m - 1) // m * m


def _cdiv(a, b):
    return (a + b - 1) // b


def _vmem_capacity_bytes():
    try:
        return int(pltpu.get_tpu_info().vmem_capacity_bytes)
    except Exception:
        return 64 << 20                    # conservative (v7x-sized) default


def _num_tensorcores():
    try:
        kind = jax.devices()[0].device_kind.lower()
    except Exception:
        return 1
    return 2 if "v7" in kind else 1        # v7x: 2 TCs/chip; v5e/v6e: 1


def _supports_buffered():
    if not hasattr(pl, "Buffered"):
        return False
    try:
        return "pipeline_mode" in inspect.signature(pl.BlockSpec).parameters
    except (TypeError, ValueError):
        return False


# ---------------------------------------------------------------------------
# Kernel
# ---------------------------------------------------------------------------
def _linear_ln_relu_kernel(x_ref, w_ref, b_ref, g_ref, beta_ref, o_ref,
                           *scratch, inv_n, n_k):
    """One (tm, Np) output tile, accumulated over the K grid axis.

    x_ref    : (tm, tk)   activation tile
    w_ref    : (tk, Np)   pre-transposed weight tile (lane-dense)
    b/g/beta : (1, Np)    f32 epilogue params (zero past the true out_dim)
    o_ref    : (tm, Np)   output tile (lane-dense, Np % 128 == 0)
    scratch  : () if n_k == 1 else ((tm, Np) f32 accumulator,)
    """
    part = jnp.dot(x_ref[...], w_ref[...], preferred_element_type=jnp.float32)

    def epilogue(y):
        y = y + b_ref[...]                               # f32 epilogue
        # Padded feature columns are exactly zero (zero-padded W cols & bias),
        # so summing over the padded width and dividing by the true out_dim
        # reproduces the unpadded LayerNorm statistics exactly.
        # NOTE: E[y^2]-E[y]^2 can lose precision when |mean| >> std; the
        # max(.,0) guard keeps it finite for the intended activation scales.
        s = jnp.sum(y, axis=-1, keepdims=True)
        ss = jnp.sum(y * y, axis=-1, keepdims=True)
        mean = s * inv_n
        var = jnp.maximum(ss * inv_n - mean * mean, 0.0)
        y = (y - mean) * lax.rsqrt(var + LN_EPS)
        y = y * g_ref[...] + beta_ref[...]
        o_ref[...] = jnp.maximum(y, 0.0).astype(o_ref.dtype)

    if n_k == 1:
        epilogue(part)
    else:
        acc_ref, = scratch
        k = pl.program_id(1)

        @pl.when(k == 0)
        def _():
            acc_ref[...] = part

        @pl.when(jnp.logical_and(k > 0, k < n_k - 1))
        def _():
            acc_ref[...] += part

        @pl.when(k == n_k - 1)
        def _():
            # Fused final dot + epilogue: no redundant acc store/reload.
            epilogue(acc_ref[...] + part)


# ---------------------------------------------------------------------------
# One-time parameter preparation (outside the hot path)
# ---------------------------------------------------------------------------
class PreparedParams(NamedTuple):
    w_t: jax.Array        # (Kp, Np) pre-transposed / padded / cast weight
    b_row: jax.Array      # (1, Np) f32
    g_row: jax.Array      # (1, Np) f32
    beta_row: jax.Array   # (1, Np) f32
    in_dim: int
    out_dim: int
    kp: int
    np_: int
    tk: int


def prepare_params(weight, bias, gamma, beta, *, block_k=512,
                   matmul_dtype=None, lane_align=128):
    """Prep params once at init time.

    weight: (out_dim, in_dim) PyTorch layout.  block_k / lane_align must be
    multiples of 128.  K is zero-padded up to a multiple of block_k so the
    kernel always uses tk == block_k (zero-padding is exact for this op).
    matmul_dtype (e.g. jnp.bfloat16) halves weight HBM traffic and is
    recommended on v5e/v6e/v7x; accumulation and the LN epilogue stay f32.
    """
    assert block_k % 128 == 0 and lane_align % 128 == 0
    out_dim, in_dim = weight.shape

    kp = _round_up(in_dim, 128)
    if kp > block_k:
        kp = _round_up(in_dim, block_k)
        tk = block_k
    else:
        tk = kp
    np_ = _round_up(out_dim, lane_align)

    w_t = jnp.asarray(weight).T                                # (in, out)
    w_t = jnp.pad(w_t, ((0, kp - in_dim), (0, np_ - out_dim)))
    if matmul_dtype is not None:
        w_t = w_t.astype(matmul_dtype)

    def row(p):
        return jnp.pad(jnp.asarray(p, jnp.float32),
                       (0, np_ - out_dim)).reshape(1, np_)

    return PreparedParams(w_t=w_t, b_row=row(bias), g_row=row(gamma),
                          beta_row=row(beta), in_dim=in_dim, out_dim=out_dim,
                          kp=kp, np_=np_, tk=tk)


# ---------------------------------------------------------------------------
# pallas_call wrapper (jitted; tile geometry is static)
# ---------------------------------------------------------------------------
@functools.partial(
    jax.jit,
    static_argnames=("kp", "np_", "tk", "tm", "out_dim", "k_buffers",
                     "vmem_limit", "out_dtype", "cast_dtype"))
def _fused_linear_ln_relu(x2d, w_t, b_row, g_row, beta_row, *, kp, np_, tk,
                          tm, out_dim, k_buffers, vmem_limit, out_dtype,
                          cast_dtype):
    m, in_dim = x2d.shape
    if in_dim != kp:
        # Zero-padding the contraction dim is exact (padded W rows are zero).
        x2d = jnp.pad(x2d, ((0, 0), (0, kp - in_dim)))
    if cast_dtype is not None and x2d.dtype != cast_dtype:
        x2d = x2d.astype(cast_dtype)

    n_k = kp // tk
    m_steps = _cdiv(m, tm)

    xb = x2d.dtype.itemsize
    wb = w_t.dtype.itemsize
    ob = jnp.dtype(out_dtype).itemsize

    cost = pl.CostEstimate(
        flops=2 * m * kp * np_,
        transcendentals=m,                           # one rsqrt per row
        bytes_accessed=(m * kp * xb                  # x read once
                        + kp * np_ * wb * m_steps    # W re-streamed per M tile
                        + m * np_ * ob))             # output written once

    use_buffered = (k_buffers != 2 and _supports_buffered())

    def stream_spec(shape, index_map):
        if use_buffered:
            return pl.BlockSpec(shape, index_map,
                                pipeline_mode=pl.Buffered(k_buffers))
        return pl.BlockSpec(shape, index_map)

    in_specs = [
        stream_spec((tm, tk), lambda i, k: (i, k)),     # x
        stream_spec((tk, np_), lambda i, k: (k, 0)),    # W^T (lane-dense rows)
        pl.BlockSpec((1, np_), lambda i, k: (0, 0)),    # bias
        pl.BlockSpec((1, np_), lambda i, k: (0, 0)),    # gamma
        pl.BlockSpec((1, np_), lambda i, k: (0, 0)),    # beta
    ]
    scratch_shapes = ([pltpu.VMEM((tm, np_), jnp.float32)] if n_k > 1 else [])

    kernel = functools.partial(_linear_ln_relu_kernel,
                               inv_n=1.0 / out_dim, n_k=n_k)

    out = pl.pallas_call(
        kernel,
        out_shape=jax.ShapeDtypeStruct((m, np_), out_dtype),
        grid_spec=pltpu.PrefetchScalarGridSpec(
            num_scalar_prefetch=0,
            grid=(m_steps, n_k),
            in_specs=in_specs,
            out_specs=pl.BlockSpec((tm, np_), lambda i, k: (i, 0)),
            scratch_shapes=scratch_shapes),
        compiler_params=pltpu.CompilerParams(
            dimension_semantics=("parallel", "arbitrary"),
            vmem_limit_bytes=vmem_limit),
        cost_estimate=cost,
    )(x2d, w_t, b_row, g_row, beta_row)

    if np_ != out_dim:
        out = out[:, :out_dim]
    return out


# ---------------------------------------------------------------------------
# Public entry point
# ---------------------------------------------------------------------------
def linear_ln_relu(vec, params: PreparedParams, *, block_m=512,
                   k_buffers: Optional[int] = None):
    """vec: (..., in_dim); params: from prepare_params()."""
    lead_shape = vec.shape[:-1]
    out_dtype = vec.dtype
    x2d = vec.reshape(-1, params.in_dim)
    m = x2d.shape[0]

    kp, np_, tk = params.kp, params.np_, params.tk
    n_k = kp // tk

    cast_dtype = (params.w_t.dtype
                  if params.w_t.dtype != jnp.dtype(vec.dtype) else None)
    xb = (jnp.dtype(cast_dtype) if cast_dtype is not None
          else jnp.dtype(vec.dtype)).itemsize
    wb = params.w_t.dtype.itemsize
    ob = jnp.dtype(out_dtype).itemsize

    vmem_phys = _vmem_capacity_bytes()
    num_tc = _num_tensorcores()
    # Leave headroom for Mosaic internal scratch / semaphores: ~48 MiB budget
    # on 64 MiB parts (v7x), ~100 MiB on 128 MiB parts (v5e/v6e).
    if vmem_phys <= (64 << 20):
        budget = 48 << 20
    else:
        budget = min(vmem_phys - (28 << 20), 100 << 20)

    def footprint(tm_, bufs):
        v = bufs * tm_ * tk * xb              # x blocks
        v += bufs * tk * np_ * wb             # weight blocks
        v += 2 * tm_ * np_ * ob               # output blocks
        if n_k > 1:
            v += tm_ * np_ * 4                # f32 accumulator scratch
        v += 3 * 2 * 8 * np_ * 4              # bias/gamma/beta rows
        return v

    # ---- choose tm ---------------------------------------------------------
    tm = min(block_m, max(8, _round_up(m, 8)))
    # On 2-TC parts (v7x) make sure the "parallel" M axis has >= num_tc steps.
    if num_tc > 1 and m >= 2 * 128:
        tm = min(tm, max(128, _round_up(_cdiv(m, num_tc), 8)))

    # ---- choose K-axis buffer depth ----------------------------------------
    if k_buffers is None:
        k_buffers = 3 if (vmem_phys > (96 << 20) and n_k >= 4
                          and footprint(tm, 3) <= budget) else 2
    k_buffers = max(2, int(k_buffers))
    if n_k < 2:
        k_buffers = 2

    # ---- shrink until the resident footprint fits the budget ---------------
    while footprint(tm, k_buffers) > budget and k_buffers > 2:
        k_buffers -= 1
    while footprint(tm, k_buffers) > budget and tm > 128:
        tm = max(128, tm // 2)
    # TODO(synk): tile the N (feature) axis for very large out_dim on v7x
    # (needs a two-pass LayerNorm with partial s/ss scratch) instead of
    # relying on tm=128 fitting.

    est = footprint(tm, k_buffers)
    vmem_limit = int(min(max(int(est * 1.3) + (4 << 20), 32 << 20),
                         vmem_phys - (4 << 20)))

    out = _fused_linear_ln_relu(
        x2d, params.w_t, params.b_row, params.g_row, params.beta_row,
        kp=kp, np_=np_, tk=tk, tm=tm, out_dim=params.out_dim,
        k_buffers=k_buffers, vmem_limit=vmem_limit, out_dtype=out_dtype,
        cast_dtype=cast_dtype)
    return out.reshape(*lead_shape, params.out_dim)


# ---------------------------------------------------------------------------
# Init matching the PyTorch module, plus a pure-JAX reference
# ---------------------------------------------------------------------------
def init_params(key, in_dim, out_dim, dtype=jnp.float32):
    """Deterministic init matching the PyTorch module's __init__."""
    bound = jnp.sqrt(6.0 / (in_dim + out_dim)).astype(dtype)   # xavier_uniform_
    weight = jax.random.uniform(key, (out_dim, in_dim), dtype=dtype,
                                minval=-bound, maxval=bound)
    bias = jnp.ones((out_dim,), dtype=dtype)    # nn.init.constant_(bias, 1.0)
    gamma = jnp.ones((out_dim,), dtype=dtype)   # LayerNorm weight
    beta = jnp.zeros((out_dim,), dtype=dtype)   # LayerNorm bias
    return weight, bias, gamma, beta


def _reference(vec, weight, bias, gamma, beta):
    y = vec @ weight.T + bias
    mean = jnp.mean(y, axis=-1, keepdims=True)
    var = jnp.mean((y - mean) ** 2, axis=-1, keepdims=True)
    y = (y - mean) / jnp.sqrt(var + LN_EPS) * gamma + beta
    return jnp.maximum(y, 0.0)


if __name__ == "__main__":
    key = jax.random.PRNGKey(0)
    k_x, k_w, k_x2, k_w2 = jax.random.split(key, 4)

    # --- Test 1: small module-like shapes, f32, single K step --------------
    batch, seq, in_dim, out_dim = 2, 8, 32, 64
    vec = jax.random.normal(k_x, (batch, seq, in_dim), dtype=jnp.float32)
    weight, bias, gamma, beta = init_params(k_w, in_dim, out_dim)
    prm = prepare_params(weight, bias, gamma, beta)
    out = jax.block_until_ready(linear_ln_relu(vec, prm))
    ref = _reference(vec, weight, bias, gamma, beta)
    assert out.shape == (batch, seq, out_dim)
    assert jnp.allclose(out, ref, atol=1e-4, rtol=1e-4), (
        float(jnp.max(jnp.abs(out - ref))))

    # --- Test 2: multi-step M and K grids (accumulator + fused last dot) ---
    b2, s2, in2, out2 = 4, 64, 384, 256
    vec2 = jax.random.normal(k_x2, (b2, s2, in2), dtype=jnp.float32)
    w2, bi2, g2, be2 = init_params(k_w2, in2, out2)
    prm2 = prepare_params(w2, bi2, g2, be2, block_k=128)
    out_t2 = jax.block_until_ready(
        linear_ln_relu(vec2, prm2, block_m=128))
    ref2 = _reference(vec2, w2, bi2, g2, be2)
    assert out_t2.shape == (b2, s2, out2)
    assert jnp.allclose(out_t2, ref2, atol=1e-4, rtol=1e-4), (
        float(jnp.max(jnp.abs(out_t2 - ref2))))

    # --- Test 3: bf16-fed MXU (f32 acc + f32 LN) and deeper K buffering ----
    prm3 = prepare_params(w2, bi2, g2, be2, block_k=128,
                          matmul_dtype=jnp.bfloat16)
    out_t3 = jax.block_until_ready(
        linear_ln_relu(vec2, prm3, block_m=128, k_buffers=3))
    assert jnp.allclose(out_t3, ref2, atol=1e-1, rtol=1e-1), (
        float(jnp.max(jnp.abs(out_t3 - ref2))))

    print("KERNEL_OK")
</pallas_src>

<mosaic_0001>
module attributes {stable_mosaic.version = 11 : i64} {
  func.func @_linear_ln_relu_kernel(%arg0: i32, %arg1: i32, %arg2: memref<16x128xf32, #tpu.memory_space<vmem>>, %arg3: memref<128x128xf32, #tpu.memory_space<vmem>>, %arg4: memref<1x128xf32, #tpu.memory_space<vmem>>, %arg5: memref<1x128xf32, #tpu.memory_space<vmem>>, %arg6: memref<1x128xf32, #tpu.memory_space<vmem>>, %arg7: memref<16x128xf32, #tpu.memory_space<vmem>>) attributes {dimension_semantics = [#tpu.dimension_semantics<parallel>, #tpu.dimension_semantics<arbitrary>], iteration_bounds = array<i64: 1, 1>, scalar_prefetch = 0 : i64, scratch_operands = 0 : i64, tpu.core_type = #tpu.core_type<tc>, window_params = [{transform_indices = @transform_0, window_bounds = array<i64: 16, 128>}, {transform_indices = @transform_1, window_bounds = array<i64: 128, 128>}, {pipeline_mode = #tpu.pipeline_mode<synchronous>, transform_indices = @transform_2, window_bounds = array<i64: 1, 128>}, {pipeline_mode = #tpu.pipeline_mode<synchronous>, transform_indices = @transform_3, window_bounds = array<i64: 1, 128>}, {pipeline_mode = #tpu.pipeline_mode<synchronous>, transform_indices = @transform_4, window_bounds = array<i64: 1, 128>}, {transform_indices = @transform_5, window_bounds = array<i64: 16, 128>}]} {
    %c0 = arith.constant 0 : index
    %c0_0 = arith.constant 0 : index
    %0 = vector.load %arg2[%c0, %c0_0] : memref<16x128xf32, #tpu.memory_space<vmem>>, vector<16x128xf32>
    %c0_1 = arith.constant 0 : index
    %c0_2 = arith.constant 0 : index
    %1 = vector.load %arg3[%c0_1, %c0_2] : memref<128x128xf32, #tpu.memory_space<vmem>>, vector<128x128xf32>
    %cst = arith.constant dense<0.000000e+00> : vector<16x128xf32>
    %2 = tpu.matmul %0, %1, %cst {dimension_numbers = #tpu.dot_dimension_numbers<[1], [0], [0], [1], [0, 0, 1, 1], [], []>} : vector<16x128xf32>, vector<128x128xf32>, vector<16x128xf32> -> vector<16x128xf32>
    %c0_3 = arith.constant 0 : index
    %c0_4 = arith.constant 0 : index
    %3 = vector.load %arg4[%c0_3, %c0_4] : memref<1x128xf32, #tpu.memory_space<vmem>>, vector<1x128xf32>
    %4 = vector.broadcast %3 : vector<1x128xf32> to vector<16x128xf32>
    %5 = arith.addf %2, %4 : vector<16x128xf32>
    %cst_5 = arith.constant dense<0.000000e+00> : vector<16xf32>
    %6 = vector.multi_reduction <add>, %5, %cst_5 [1] : vector<16x128xf32> to vector<16xf32>
    %7 = vector.shape_cast %6 : vector<16xf32> to vector<16x1xf32>
    %8 = arith.mulf %5, %5 : vector<16x128xf32>
    %cst_6 = arith.constant dense<0.000000e+00> : vector<16xf32>
    %9 = vector.multi_reduction <add>, %8, %cst_6 [1] : vector<16x128xf32> to vector<16xf32>
    %10 = vector.shape_cast %9 : vector<16xf32> to vector<16x1xf32>
    %cst_7 = arith.constant 1.562500e-02 : f32
    %11 = vector.broadcast %cst_7 : f32 to vector<16x1xf32>
    %12 = arith.mulf %7, %11 : vector<16x1xf32>
    %cst_8 = arith.constant 1.562500e-02 : f32
    %13 = vector.broadcast %cst_8 : f32 to vector<16x1xf32>
    %14 = arith.mulf %10, %13 : vector<16x1xf32>
    %15 = arith.mulf %12, %12 : vector<16x1xf32>
    %16 = arith.subf %14, %15 : vector<16x1xf32>
    %cst_9 = arith.constant 0.000000e+00 : f32
    %17 = vector.broadcast %cst_9 : f32 to vector<16x1xf32>
    %18 = arith.maximumf %16, %17 : vector<16x1xf32>
    %19 = vector.broadcast %12 : vector<16x1xf32> to vector<16x128xf32>
    %20 = arith.subf %5, %19 : vector<16x128xf32>
    %cst_10 = arith.constant 9.99999974E-6 : f32
    %21 = vector.broadcast %cst_10 : f32 to vector<16x1xf32>
    %22 = arith.addf %18, %21 : vector<16x1xf32>
    %23 = math.rsqrt %22 : vector<16x1xf32>
    %24 = vector.broadcast %23 : vector<16x1xf32> to vector<16x128xf32>
    %25 = arith.mulf %20, %24 : vector<16x128xf32>
    %c0_11 = arith.constant 0 : index
    %c0_12 = arith.constant 0 : index
    %26 = vector.load %arg5[%c0_11, %c0_12] : memref<1x128xf32, #tpu.memory_space<vmem>>, vector<1x128xf32>
    %27 = vector.broadcast %26 : vector<1x128xf32> to vector<16x128xf32>
    %28 = arith.mulf %25, %27 : vector<16x128xf32>
    %c0_13 = arith.constant 0 : index
    %c0_14 = arith.constant 0 : index
    %29 = vector.load %arg6[%c0_13, %c0_14] : memref<1x128xf32, #tpu.memory_space<vmem>>, vector<1x128xf32>
    %30 = vector.broadcast %29 : vector<1x128xf32> to vector<16x128xf32>
    %31 = arith.addf %28, %30 : vector<16x128xf32>
    %cst_15 = arith.constant 0.000000e+00 : f32
    %32 = vector.broadcast %cst_15 : f32 to vector<16x128xf32>
    %33 = arith.maximumf %31, %32 : vector<16x128xf32>
    %c0_16 = arith.constant 0 : index
    %c0_17 = arith.constant 0 : index
    %34 = vector.load %arg7[%c0_16, %c0_17] : memref<16x128xf32, #tpu.memory_space<vmem>>, vector<16x128xf32>
    tpu.vector_store %arg7[%c0_16, %c0_17], %33 {strides = array<i32>} : memref<16x128xf32, #tpu.memory_space<vmem>>, vector<16x128xf32>,
    return
  }
  func.func @transform_0(%arg0: i32, %arg1: i32) -> (i32, i32) {
    %c0_i32 = arith.constant 0 : i32
    return %arg0, %arg1 : i32, i32
  }
  func.func @transform_1(%arg0: i32, %arg1: i32) -> (i32, i32) {
    %c0_i32 = arith.constant 0 : i32
    %c0_i32_0 = arith.constant 0 : i32
    return %arg1, %c0_i32 : i32, i32
  }
  func.func @transform_2(%arg0: i32, %arg1: i32) -> (i32, i32) {
    %c0_i32 = arith.constant 0 : i32
    %c0_i32_0 = arith.constant 0 : i32
    %c0_i32_1 = arith.constant 0 : i32
    return %c0_i32, %c0_i32_0 : i32, i32
  }
  func.func @transform_3(%arg0: i32, %arg1: i32) -> (i32, i32) {
    %c0_i32 = arith.constant 0 : i32
    %c0_i32_0 = arith.constant 0 : i32
    %c0_i32_1 = arith.constant 0 : i32
    return %c0_i32, %c0_i32_0 : i32, i32
  }
  func.func @transform_4(%arg0: i32, %arg1: i32) -> (i32, i32) {
    %c0_i32 = arith.constant 0 : i32
    %c0_i32_0 = arith.constant 0 : i32
    %c0_i32_1 = arith.constant 0 : i32
    return %c0_i32, %c0_i32_0 : i32, i32
  }
  func.func @transform_5(%arg0: i32, %arg1: i32) -> (i32, i32) {
    %c0_i32 = arith.constant 0 : i32
    %c0_i32_0 = arith.constant 0 : i32
    return %arg0, %c0_i32 : i32, i32
  }
}

</mosaic_0001>

<bundles_post_ra>
// kernel: _fused_linear_ln_relu.1
= control target key start
LH: loop header
LB: loop body
LE: loop exit
PB: predicated region body
PF: predicated region fallthrough
CT: control target
= control target key end

     0   :  { %10 = vsyncpa [#allocation3], 0  ;;  %s425_s0 = inlined_call_operand.vmem [shape: f32[16,128], index: 0, kind: input, shape index: {}]   ;;  %s426_s1 = inlined_call_operand.hbm [shape: f32[128,128], index: 1, kind: input, shape index: {}]   ;;  %s427_s2 = inlined_call_operand.vmem [shape: f32[1,128], index: 2, kind: input, shape index: {}]   ;;  %s428_s3 = inlined_call_operand.vmem [shape: f32[1,128], index: 3, kind: input, shape index: {}]   ;;  %s429_s4 = inlined_call_operand.vmem [shape: f32[1,128], index: 4, kind: input, shape index: {}]   ;;  %s430_s5 = inlined_call_operand.hbm [shape: f32[16,128], index: 5, kind: output, shape index: {}]  }
   0x1   :  { %11 = vsyncpa [#allocation4], 0  ;;  %s346_s18 = smov [#allocation2]   ;;  %s298_s22 = scalar_lea.hbm %s426_s1, 2048 }
   0x2   :  { %s19_s19 = sshll.u32 %s346_s18, 4  ;;  %p299_p0 = scmp.ne.s32.totalorder %s426_s1, %s298_s22  ;;  %s20_s19 = int_to_ptr.vmem [resolvable:$true] %s19_s19 }
   0x3   :  { %p302_p1 = scmp.lt.u32.totalorder %s298_s22, %s426_s1 }
   0x5   :  { %p304_p2 = pnand %p302_p1, %p299_p0 }
   0x7   :  { %307 = shalt.err (!%p304_p2)
}
   0x8   :  { %s308_s27 = scalar_lea.vmem %s20_s19, 2048  ;;  %p313_p4 = scmp.lt.s32.totalorder %s20_s19, %s20_s19 }
   0x9   :  { %p309_p3 = scmp.ne.s32.totalorder %s20_s19, %s308_s27  ;;  %p314_p5 = scmp.lt.s32.totalorder %s308_s27, %s308_s27 }
   0xb   :  { %p315_p6 = por %p314_p5, %p313_p4 }
   0xd   :  { %p316_p7 = pnand %p315_p6, %p309_p3 }
   0xf   :  { %319 = shalt.err (!%p316_p7)
}
  0x10   :  { %s347_s28 = smov 128   ;;  %s348_s29 = smov 8  }
  0x11   :  { %25 = dma.hbm_to_vmem [thread:$0]  %s426_s1, 2048, %s20_s19, [#allocation3], %s347_s28, %s347_s28, %s348_s29  }
  0x12   :  { %342 = dma.done.wait [#allocation3], 2048  }
  0x13   :  { %343 = vsyncadd [#allocation3], 4294965248  ;;  %v37_v0 = vld [vmem:[#allocation2] sm:$0xff]  ;;  %v38_v1 = vld [vmem:[#allocation2 + $0x8] sm:$0xff]  ;;  %s349_s14 = smov [#allocation5]  }
  0x14   :  { %v39_v2 = vld [vmem:[#allocation2 + $0x10] sm:$0xff]  ;;  %v258_v3 = vpack.c.bf16 %v38_v1, %v37_v0  ;;  %v40_v4 = vld [vmem:[#allocation2 + $0x18] sm:$0xff]  ;;  %v41_v6 = vld [vmem:[#allocation2 + $0x20] sm:$0xff]  ;;  %s190_s15 = sshll.u32 %s349_s14, 4  ;;  %s191_s15 = int_to_ptr.vmem [resolvable:$true] %s190_s15 }
  0x15   :  { %v262_v5 = vpack.c.bf16 %v40_v4, %v39_v2  ;;  %v42_v7 = vld [vmem:[#allocation2 + $0x28] sm:$0xff]  ;;  %v35_v9 = vld [vmem:[%s425_s0] sm:$0xff]  ;;  %v44_v11 = vld [vmem:[#allocation2 + $0x38] sm:$0xff]  ;;  %p325_p9 = scmp.lt.s32.totalorder %s191_s15, %s191_s15 }
  0x16   :  { %259 = vmatprep.subr.bf16.mxu0 %v258_v3  ;;  %v266_v8 = vpack.c.bf16 %v42_v7, %v41_v6  ;;  %v43_v10 = vld [vmem:[#allocation2 + $0x30] sm:$0xff]  ;;  %255 = vmatprep.mubr.f32.mxu0 %v35_v9  ;;  %v45_v13 = vld [vmem:[#allocation2 + $0x40] sm:$0xff]  ;;  %v46_v14 = vld [vmem:[#allocation2 + $0x48] sm:$0xff] }
  0x17   :  { %261 = vmatpush3.bf16.msra.mxu0 %v258_v3  ;;  %v270_v12 = vpack.c.bf16 %v44_v11, %v43_v10  ;;  %v274_v15 = vpack.c.bf16 %v46_v14, %v45_v13  ;;  %v47_v16 = vld [vmem:[#allocation2 + $0x50] sm:$0xff]  ;;  %v48_v17 = vld [vmem:[#allocation2 + $0x58] sm:$0xff]  ;;  %v49_v19 = vld [vmem:[#allocation2 + $0x60] sm:$0xff] }
  0x18   :  { %263 = vmatprep.subr.bf16.mxu0 %v262_v5  ;;  %v278_v18 = vpack.c.bf16 %v48_v17, %v47_v16  ;;  %v50_v20 = vld [vmem:[#allocation2 + $0x68] sm:$0xff]  ;;  %v51_v22 = vld [vmem:[#allocation2 + $0x70] sm:$0xff]  ;;  %v52_v23 = vld [vmem:[#allocation2 + $0x78] sm:$0xff] }
  0x19   :  { %v282_v21 = vpack.c.bf16 %v50_v20, %v49_v19  ;;  %v286_v24 = vpack.c.bf16 %v52_v23, %v51_v22  ;;  %v36_v25 = vld [vmem:[%s425_s0 + $0x8] sm:$0xff]  ;;  %v202_v26 = vld [vmem:[%s427_s2] ss:$0 sm:$0xff] }
  0x1a   :  { %v203_v51 = vld [vmem:[%s428_s3] ss:$0 sm:$0xff]  ;;  %s320_s3 = scalar_lea.vmem %s191_s15, 256 }
  0x1b   :  { %265 = vmatpush3.bf16.msra.mxu0 %v262_v5  ;;  %v204_v53 = vld [vmem:[%s429_s4] ss:$0 sm:$0xff]  ;;  %p321_p8 = scmp.ne.s32.totalorder %s191_s15, %s320_s3  ;;  %p326_p10 = scmp.lt.s32.totalorder %s320_s3, %s320_s3 }
  0x1c   :  { %267 = vmatprep.subr.bf16.mxu0 %v266_v8 }
  0x1d   :  { %p327_p11 = por %p326_p10, %p325_p9 }
  0x1f   :  { %269 = vmatpush3.bf16.msra.mxu0 %v266_v8  ;;  %p328_p12 = pnand %p327_p11, %p321_p8 }
  0x20   :  { %271 = vmatprep.subr.bf16.mxu0 %v270_v12 }
  0x23   :  { %273 = vmatpush3.bf16.msra.mxu0 %v270_v12 }
  0x24   :  { %275 = vmatprep.subr.bf16.mxu0 %v274_v15 }
  0x27   :  { %277 = vmatpush3.bf16.msra.mxu0 %v274_v15 }
  0x28   :  { %279 = vmatprep.subr.bf16.mxu0 %v278_v18 }
  0x2b   :  { %281 = vmatpush3.bf16.msra.mxu0 %v278_v18 }
  0x2c   :  { %283 = vmatprep.subr.bf16.mxu0 %v282_v21 }
  0x2f   :  { %285 = vmatpush3.bf16.msra.mxu0 %v282_v21 }
  0x30   :  { %287 = vmatprep.subr.bf16.mxu0 %v286_v24 }
  0x33   :  { %289 = vmatpush3.bf16.msra.mxu0 %v286_v24 }
  0x36   :  { %256 = vmatmul.mubr.f32.vlgmr.msra.gmra.mrb[0].mxu0 %v36_v25 }
 0x109   :  { %v257_v27 = vpop.f32.mrb[0].mxu0 }
 0x10a   :  { %v126_v28 = vpop.f32.mrb[1].mxu0  ;;  %v132_v30 = vadd.f32 %v257_v27, %v202_v26 }
 0x10b   :  { %v127_v29 = vadd.f32 %v202_v26, %v126_v28 }
 0x10c   :  { %v140_v32 = vmul.f32 %v132_v30, %v132_v30 }
 0x10d   :  { %135 = vadd.xlane.f32.xlu0 %v127_v29  ;;  %v139_v31 = vmul.f32 %v127_v29, %v127_v29 }
 0x10f   :  { %141 = vadd.xlane.f32.xlu1 %v139_v31 }
 0x111   :  { %137 = vadd.xlane.f32.xlu0 %v132_v30 }
 0x113   :  { %143 = vadd.xlane.f32.xlu1 %v140_v32 }
 0x19a   :  { %v136_v33 = vpop.xlane.xlu0 %135 }
 0x19b   :  { %v145_v34 = vmul.f32 0.015625, %v136_v33 }
 0x19c   :  { %v142_v35 = vpop.xlane.xlu1 %141 }
 0x19d   :  { %v149_v36 = vmul.f32 %v145_v34, %v145_v34  ;;  %v147_v37 = vmul.f32 0.015625, %v142_v35  ;;  %v155_v49 = vsub.f32 %v127_v29, %v145_v34 }
 0x19e   :  { %v138_v38 = vpop.xlane.xlu0 %137 }
 0x19f   :  { %v151_v39 = vsub.f32 %v147_v37, %v149_v36  ;;  %v146_v40 = vmul.f32 0.015625, %v138_v38 }
 0x1a0   :  { %v144_v41 = vpop.xlane.xlu1 %143 }
 0x1a1   :  { %v153_v42 = vmax.f32 %v151_v39, 0.0  ;;  %v150_v43 = vmul.f32 %v146_v40, %v146_v40  ;;  %v148_v44 = vmul.f32 0.015625, %v144_v41  ;;  %v156_v54 = vsub.f32 %v132_v30, %v146_v40 }
 0x1a3   :  { %v157_v45 = vadd.f32 1e-05, %v153_v42  ;;  %v152_v46 = vsub.f32 %v148_v44, %v150_v43 }
 0x1a5   :  { %294 = vrsqrt.f32 %v157_v45  ;;  %v154_v47 = vmax.f32 %v152_v46, 0.0 }
 0x1a7   :  { %v158_v48 = vadd.f32 1e-05, %v154_v47 }
 0x1a9   :  { %296 = vrsqrt.f32 %v158_v48 }
 0x1af   :  { %v295_v50 = vpop.eup %294 }
 0x1b0   :  { %v161_v52 = vmul.f32 %v295_v50, %v155_v49 }
 0x1b2   :  { %v170_v55 = vmul.f32 %v203_v51, %v161_v52 }
 0x1b3   :  { %v297_v56 = vpop.eup %296 }
 0x1b4   :  { %v162_v57 = vmul.f32 %v297_v56, %v156_v54  ;;  %v179_v58 = vadd.f32 %v204_v53, %v170_v55 }
 0x1b6   :  { %v171_v59 = vmul.f32 %v203_v51, %v162_v57  ;;  %v181_v60 = vmax.f32 %v179_v58, 0.0 }
 0x1b8   :  { %v180_v61 = vadd.f32 %v204_v53, %v171_v59  ;;  %183 = vst [vmem:[#allocation5] sm:$0xff] %v181_v60 }
 0x1ba   :  { %v182_v62 = vmax.f32 %v180_v61, 0.0 }
 0x1bc   :  { %184 = vst [vmem:[#allocation5 + $0x8] sm:$0xff] %v182_v62 }
 0x1bd   :  { %331 = shalt.err (!%p328_p12)
}
 0x1be   :  { %s332_s17 = scalar_lea.hbm %s430_s5, 256 }
 0x1bf   :  { %p333_p13 = scmp.ne.s32.totalorder %s430_s5, %s332_s17  ;;  %p336_p0 = scmp.lt.u32.totalorder %s332_s17, %s430_s5 }
 0x1c1   :  { %p338_p1 = pnand %p336_p0, %p333_p13 }
 0x1c3   :  { %341 = shalt.err (!%p338_p1)
}
 0x1c4   :  { %196 = dma.vmem_to_hbm [thread:$0]  %s191_s15, 256, %s430_s5, [#allocation4], %s347_s28, %s347_s28, %s348_s29  }
 0x1c5   :  { %344 = dma.done.wait [#allocation4], 256  }
 0x1c6   :  { %345 = vsyncadd [#allocation4], 4294967040 }
 0x1c7   :  { %200 = vsyncpa [#allocation3], 1 }
 0x1c8   :  { %201 = vsyncpa [#allocation4], 1 }

</bundles_post_ra>
